<compile_context>
chip_gen: v6e
topology: v6e:2x2x1
jax: 0.10.0
libtpu: 0.0.40
codegen_flags: <defaults>
</compile_context>

<pallas_src>
import math

import jax
import jax.numpy as jnp
from jax import lax
from jax.experimental import pallas as pl
from jax.experimental.pallas import tpu as pltpu


def _left_right_pad(k):
    """PyTorch Conv2d(padding='same') asymmetric padding for kernel size k."""
    total = k - 1
    left = total // 2
    return left, total - left


def _cdiv(a, b):
    return -(-a // b)


def _pick_rows(B, H, W, bytes_per_h_row, vmem_budget, target_steps):
    """How many EEG/batch slices (rows of H) each block covers.

    Goals (perf review): rows*W a multiple of 128 (lane-dense) unless the block
    spans the full H*W axis; ~target_steps or more total grid steps so the
    software pipeline overlaps adjacent DMAs (and each v7x TensorCore gets
    several steps); per-block VMEM within a v7x-safe budget.
    """
    align = 128 // math.gcd(W, 128)
    if H <= align:
        return H                       # single block: last dim == full H*W
    cap = min(H, max(1, vmem_budget // max(1, bytes_per_h_row)))
    cap = (cap // align) * align
    if cap < align:
        cap = align                    # lane density beats the soft VMEM budget
    rows = align
    r = align
    while r <= cap:                    # largest block still giving >= target steps
        if B * _cdiv(H, r) >= target_steps:
            rows = r
        r += align
    if B * _cdiv(H, rows) < target_steps:
        # Problem too small for the step target: grow toward ~1K-lane blocks.
        while rows + align <= cap and rows * W < 1024:
            rows += align
    return rows


def _make_kernel(cin, kmax, lmax, W, p_blk, n_cols, compute_dtype):
    """Kernel body.  Block layout:
         x_ref   : (cin, p_blk)        p_blk = rows*W, rows EEG slices back-to-back
         w_ref   : (4U, n_cols + 1)    packed weights (+ BN-shift bias column)
         out_ref : (4U, p_blk)
         rhs_ref : (n_cols + 1, p_blk) VMEM scratch holding the im2col RHS
    """
    rows = p_blk // W

    def kernel(x_ref, w_ref, out_ref, rhs_ref):
        x = x_ref[...]                                     # (cin, p_blk)

        # Within-slice time index w = q mod W for every lane position, built
        # with compares/subtracts only (binary conditional subtraction), so no
        # integer division is needed on the VPU.
        w_idx = lax.broadcasted_iota(jnp.int32, (1, p_blk), 1)
        p = 1
        while p < rows:
            p <<= 1
        p >>= 1
        while p >= 1:
            t = p * W
            w_idx = w_idx - jnp.where(w_idx >= t, t, 0)
            p >>= 1

        roll_cache = {}

        def rolled(delta):
            # rolled(delta)[c, q] == x[c, (q + delta) mod p_blk]  (XLU lane roll)
            if delta not in roll_cache:
                shift = (-delta) % p_blk
                roll_cache[delta] = x if shift == 0 else pltpu.roll(x, shift, axis=1)
            return roll_cache[delta]

        # --- im2col RHS, written straight into the VMEM scratch -------------
        # Row block tau holds x[c, w + tau - lmax]; it is zeroed wherever the
        # source index falls outside [0, W) of its own slice.  That is exactly
        # Conv2d(padding='same') zero padding, and it also guarantees that roll
        # wrap-around across slice / block boundaries never reaches a valid
        # output (block starts are multiples of W by construction).
        for tau in range(kmax):
            delta = tau - lmax
            s = rolled(delta)
            if delta < 0:
                s = jnp.where(w_idx >= -delta, s, 0.0)
            elif delta > 0:
                s = jnp.where(w_idx < W - delta, s, 0.0)
            rhs_ref[tau * cin:(tau + 1) * cin, :] = s.astype(compute_dtype)

        # MaxPool2d((1, 3), stride 1, padding (0, 1)): a missing neighbour at a
        # slice edge is replaced by the centre value (max(x, x) == x), so no
        # -inf / -1e30 sentinel is needed at all.
        left = jnp.where(w_idx >= 1, rolled(-1), x)
        right = jnp.where(w_idx < W - 1, rolled(1), x)
        mp = jnp.maximum(jnp.maximum(left, x), right)
        rhs_ref[kmax * cin:(kmax + 1) * cin, :] = mp.astype(compute_dtype)

        # Ones row -> the BatchNorm shift rides inside the matmul.
        rhs_ref[n_cols:n_cols + 1, :] = jnp.ones((1, p_blk), compute_dtype)

        # One fused MXU matmul for all 4U output channels (3 conv branches with
        # bottleneck + BN scale folded in, the 1x1 conv after max-pool, the BN
        # shift), then ReLU, then one lane-dense store.
        y = jnp.dot(w_ref[...], rhs_ref[...], preferred_element_type=jnp.float32)
        out_ref[...] = jnp.maximum(y, 0.0).astype(out_ref.dtype)

    return kernel


def inception_submodule(x, params, *, compute_dtype=None, out_dtype=None,
                        target_steps=8, vmem_budget_bytes=20 << 20):
    """Forward of `_InceptionSubModule` (eval mode, identity activation) as a
    single fused Pallas TPU kernel.

    x: (batch, in_channels, eeg_channels, time) -> (batch, 4*units, eeg_channels, time)

    compute_dtype / out_dtype default to x.dtype; pass jnp.bfloat16 (ideally
    with bf16 inputs) on v6e / v7x to halve the im2col scratch and the dominant
    output HBM stream.  Kept opt-in (not default) because it loosens parity
    with the f32 PyTorch module.
    """
    wb = params.get("wb")          # (Cb, Cin) bottleneck 1x1 weight, or None
    wconvs = params["wconvs"]      # list of (k_i, U, Cb), tap-major
    wm = params["wm"]              # (U, Cin)  1x1 conv after max-pool
    bn_scale = params["bn_scale"]  # (4U,) gamma / sqrt(var + eps)
    bn_shift = params["bn_shift"]  # (4U,) beta - mean * scale

    B, Cin, H, W = x.shape
    U = wm.shape[0]
    n_branches = len(wconvs)
    kernel_sizes = [w.shape[0] for w in wconvs]
    kmax = max(kernel_sizes)
    Lmax = _left_right_pad(kmax)[0]
    Uout = (n_branches + 1) * U
    n_cols = (kmax + 1) * Cin      # conv taps + max-pool block
    n_cols_b = n_cols + 1          # + ones row for the folded BN shift

    if compute_dtype is None:
        compute_dtype = x.dtype
    if out_dtype is None:
        out_dtype = x.dtype

    # ---- host-side weight packing (pure algebra; zero runtime cost) --------
    # Fold the identity-activation, bias-free bottleneck conv into each branch,
    # pack the 3 branch convs + the 1x1 conv after max-pool + the BN shift into
    # ONE (4U, (kmax+1)*Cin + 1) matrix and fold the eval-mode BN scale in.
    # TODO(synk): training-mode BatchNorm (batch statistics) and a non-identity
    # bottleneck activation cannot be folded like this; they would need
    # explicit in-kernel stages.
    hp = lax.Precision.HIGHEST
    w_big = jnp.zeros((Uout, n_cols_b), jnp.float32)
    for i, (wc, k) in enumerate(zip(wconvs, kernel_sizes)):
        li = _left_right_pad(k)[0]
        tau0 = Lmax - li
        wc32 = wc.astype(jnp.float32)
        if wb is None:                                     # use_bottleneck=False
            wf = wc32                                      # (k, U, Cin)
        else:
            wf = jnp.einsum("tub,bc->tuc", wc32, wb.astype(jnp.float32),
                            precision=hp)                  # (k, U, Cin)
        blk = jnp.transpose(wf, (1, 0, 2)).reshape(U, k * Cin)
        w_big = w_big.at[i * U:(i + 1) * U,
                         tau0 * Cin:(tau0 + k) * Cin].set(blk)
    w_big = w_big.at[n_branches * U:Uout, kmax * Cin:n_cols].set(
        wm.astype(jnp.float32))
    scale_fold = jnp.concatenate(
        [jnp.broadcast_to(bn_scale.astype(jnp.float32)[:, None], (Uout, n_cols)),
         jnp.ones((Uout, 1), jnp.float32)], axis=1)
    w_big = w_big * scale_fold
    w_big = w_big.at[:, n_cols].set(bn_shift.astype(jnp.float32))

    # ---- tiling -------------------------------------------------------------
    x_b = jnp.dtype(x.dtype).itemsize
    cd_b = jnp.dtype(compute_dtype).itemsize
    o_b = jnp.dtype(out_dtype).itemsize
    bytes_per_h_row = W * (2 * Cin * x_b      # double-buffered input block
                           + 2 * Uout * o_b   # double-buffered output block
                           + n_cols_b * cd_b  # im2col VMEM scratch
                           + 2 * Cin * x_b    # live roll / mask temporaries
                           + Uout * 4)        # f32 matmul result before store
    rows = _pick_rows(B, H, W, bytes_per_h_row, vmem_budget_bytes, target_steps)
    P_blk = rows * W
    n_chunks = _cdiv(H, rows)
    # Block boundaries must coincide with slice boundaries so roll wrap-around
    # is always caught by the in-kernel w-index masks (see kernel comment).
    assert P_blk % W == 0

    vmem_limit = int(min(max(32 << 20,
                             rows * bytes_per_h_row
                             + 2 * Uout * n_cols_b * cd_b + (4 << 20)),
                         112 << 20))

    kernel = _make_kernel(Cin, kmax, Lmax, W, P_blk, n_cols, compute_dtype)
    out_flat = pl.pallas_call(
        kernel,
        out_shape=jax.ShapeDtypeStruct((B, Uout, H * W), out_dtype),
        grid_spec=pltpu.PrefetchScalarGridSpec(
            num_scalar_prefetch=0,
            grid=(B, n_chunks),
            in_specs=[
                # x consumed through a free (B, Cin, H*W) view of the NCHW input.
                pl.BlockSpec((None, Cin, P_blk), lambda b, i: (b, 0, i)),
                # Packed weights: constant block index -> fetched once.
                pl.BlockSpec((Uout, n_cols_b), lambda b, i: (0, 0)),
            ],
            out_specs=pl.BlockSpec((None, Uout, P_blk), lambda b, i: (b, 0, i)),
            scratch_shapes=[pltpu.VMEM((n_cols_b, P_blk), compute_dtype)],
        ),
        compiler_params=pltpu.CompilerParams(
            dimension_semantics=("parallel", "parallel"),
            vmem_limit_bytes=vmem_limit),
    )(x.reshape(B, Cin, H * W), w_big.astype(compute_dtype))

    # Free view back to NCHW; no transpose / slice passes.
    return out_flat.reshape(B, Uout, H, W)


def reference_forward(x, params):
    """Pure-JAX reference (mirrors the PyTorch forward in eval mode)."""
    wb, wconvs, wm = params.get("wb"), params["wconvs"], params["wm"]
    bn_scale, bn_shift = params["bn_scale"], params["bn_shift"]
    dn = ("NCHW", "OIHW", "NCHW")

    def conv2d(inp, w, pad_w):
        return lax.conv_general_dilated(inp, w, window_strides=(1, 1),
                                        padding=[(0, 0), pad_w],
                                        dimension_numbers=dn)

    y = x if wb is None else conv2d(x, wb[:, :, None, None], (0, 0))
    outs = []
    for w in wconvs:
        k = w.shape[0]
        l, r = _left_right_pad(k)
        w_oihw = jnp.transpose(w, (1, 2, 0))[:, :, None, :]        # (U, Cb, 1, k)
        outs.append(conv2d(y, w_oihw, (l, r)))
    xp = jnp.pad(x, ((0, 0), (0, 0), (0, 0), (1, 1)),
                 constant_values=-jnp.inf)
    mp = jnp.maximum(jnp.maximum(xp[..., :-2], xp[..., 1:-1]), xp[..., 2:])
    outs.append(conv2d(mp, wm[:, :, None, None], (0, 0)))
    cat = jnp.concatenate(outs, axis=1)
    yb = cat * bn_scale[None, :, None, None] + bn_shift[None, :, None, None]
    return jnp.maximum(yb, 0.0)


if __name__ == "__main__":
    # Small shapes consistent with the module (NCHW):
    # batch=2, in_channels=4, eeg_channels=8, time_steps=64
    B, Cin, H, W = 2, 4, 8, 64
    units = 8
    bottleneck_units = 8
    max_kernel_size = 8
    kernel_sizes = [max_kernel_size // 2 ** i for i in range(3)]   # [8, 4, 2]

    key = jax.random.PRNGKey(0)
    keys = jax.random.split(key, 10)

    x = jax.random.normal(keys[0], (B, Cin, H, W), jnp.float32)

    # Deterministic synthetic parameters (shapes from __init__):
    wb = 0.3 * jax.random.normal(keys[1], (bottleneck_units, Cin), jnp.float32)
    wconvs = [0.2 * jax.random.normal(k_, (ks, units, bottleneck_units), jnp.float32)
              for k_, ks in zip(keys[2:5], kernel_sizes)]
    wm = 0.3 * jax.random.normal(keys[5], (units, Cin), jnp.float32)

    # BatchNorm2d(4*units) in eval mode: fold running stats into scale/shift.
    C_out = 4 * units
    gamma = 1.0 + 0.1 * jax.random.normal(keys[6], (C_out,), jnp.float32)
    beta = 0.1 * jax.random.normal(keys[7], (C_out,), jnp.float32)
    running_mean = 0.1 * jax.random.normal(keys[8], (C_out,), jnp.float32)
    running_var = jnp.abs(jax.random.normal(keys[9], (C_out,), jnp.float32)) + 0.5
    eps = 1e-5
    bn_scale = gamma / jnp.sqrt(running_var + eps)
    bn_shift = beta - running_mean * bn_scale

    params = dict(wb=wb, wconvs=wconvs, wm=wm,
                  bn_scale=bn_scale, bn_shift=bn_shift)

    out = inception_submodule(x, params)
    out = jax.block_until_ready(out)

    ref = reference_forward(x, params)
    assert out.shape == (B, C_out, H, W), out.shape
    assert jnp.allclose(out, ref, atol=1e-2, rtol=1e-2), \
        float(jnp.max(jnp.abs(out - ref)))

    print("KERNEL_OK")
</pallas_src>

<mosaic_0001>
module attributes {stable_mosaic.version = 11 : i64} {
  func.func @kernel(%arg0: i32, %arg1: i32, %arg2: memref<1x4x128xf32, #tpu.memory_space<vmem>>, %arg3: memref<32x37xf32, #tpu.memory_space<vmem>>, %arg4: memref<1x32x128xf32, #tpu.memory_space<vmem>>, %arg5: memref<37x128xf32, #tpu.memory_space<vmem>>) attributes {dimension_semantics = [#tpu.dimension_semantics<parallel>, #tpu.dimension_semantics<parallel>], iteration_bounds = array<i64: 2, 4>, scalar_prefetch = 0 : i64, scratch_operands = 1 : i64, tpu.core_type = #tpu.core_type<tc>, window_params = [{transform_indices = @transform_0, window_bounds = array<i64: 1, 4, 128>}, {pipeline_mode = #tpu.pipeline_mode<synchronous>, transform_indices = @transform_1, window_bounds = array<i64: 32, 37>}, {transform_indices = @transform_2, window_bounds = array<i64: 1, 32, 128>}]} {
    %c0 = arith.constant 0 : index
    %c0_0 = arith.constant 0 : index
    %c0_1 = arith.constant 0 : index
    %0 = vector.load %arg2[%c0, %c0_0, %c0_1] : memref<1x4x128xf32, #tpu.memory_space<vmem>>, vector<1x4x128xf32>
    %1 = vector.shape_cast %0 : vector<1x4x128xf32> to vector<4x128xf32>
    %2 = tpu.iota {dimensions = array<i32: 1>} : vector<1x128xi32>
    %c64_i32 = arith.constant 64 : i32
    %3 = vector.broadcast %c64_i32 : i32 to vector<1x128xi32>
    %4 = arith.cmpi sge, %2, %3 : vector<1x128xi32>
    %c64_i32_2 = arith.constant 64 : i32
    %c0_i32 = arith.constant 0 : i32
    %5 = vector.broadcast %c64_i32_2 : i32 to vector<1x128xi32>
    %6 = vector.broadcast %c0_i32 : i32 to vector<1x128xi32>
    %7 = arith.select %4, %5, %6 : vector<1x128xi1>, vector<1x128xi32>
    %8 = arith.subi %2, %7 : vector<1x128xi32>
    %c3_i32 = arith.constant 3 : i32
    %9 = tpu.dynamic_rotate %1 by %c3_i32 dim 1 : vector<4x128xf32>, i32 -> vector<4x128xf32>
    %c3_i32_3 = arith.constant 3 : i32
    %10 = vector.broadcast %c3_i32_3 : i32 to vector<1x128xi32>
    %11 = arith.cmpi sge, %8, %10 : vector<1x128xi32>
    %cst = arith.constant 0.000000e+00 : f32
    %12 = vector.shape_cast %11 : vector<1x128xi1> to vector<1x128xi1>
    %13 = vector.broadcast %12 : vector<1x128xi1> to vector<4x128xi1>
    %14 = vector.broadcast %cst : f32 to vector<4x128xf32>
    %15 = arith.select %13, %9, %14 : vector<4x128xi1>, vector<4x128xf32>
    %c0_4 = arith.constant 0 : index
    %c0_5 = arith.constant 0 : index
    %16 = vector.load %arg5[%c0_4, %c0_5] : memref<37x128xf32, #tpu.memory_space<vmem>>, vector<4x128xf32>
    tpu.vector_store %arg5[%c0_4, %c0_5], %15 {strides = array<i32>} : memref<37x128xf32, #tpu.memory_space<vmem>>, vector<4x128xf32>,
    %c2_i32 = arith.constant 2 : i32
    %17 = tpu.dynamic_rotate %1 by %c2_i32 dim 1 : vector<4x128xf32>, i32 -> vector<4x128xf32>
    %c2_i32_6 = arith.constant 2 : i32
    %18 = vector.broadcast %c2_i32_6 : i32 to vector<1x128xi32>
    %19 = arith.cmpi sge, %8, %18 : vector<1x128xi32>
    %cst_7 = arith.constant 0.000000e+00 : f32
    %20 = vector.shape_cast %19 : vector<1x128xi1> to vector<1x128xi1>
    %21 = vector.broadcast %20 : vector<1x128xi1> to vector<4x128xi1>
    %22 = vector.broadcast %cst_7 : f32 to vector<4x128xf32>
    %23 = arith.select %21, %17, %22 : vector<4x128xi1>, vector<4x128xf32>
    %c4 = arith.constant 4 : index
    %c0_8 = arith.constant 0 : index
    %24 = vector.load %arg5[%c4, %c0_8] : memref<37x128xf32, #tpu.memory_space<vmem>>, vector<4x128xf32>
    tpu.vector_store %arg5[%c4, %c0_8], %23 {strides = array<i32>} : memref<37x128xf32, #tpu.memory_space<vmem>>, vector<4x128xf32>,
    %c1_i32 = arith.constant 1 : i32
    %25 = tpu.dynamic_rotate %1 by %c1_i32 dim 1 : vector<4x128xf32>, i32 -> vector<4x128xf32>
    %c1_i32_9 = arith.constant 1 : i32
    %26 = vector.broadcast %c1_i32_9 : i32 to vector<1x128xi32>
    %27 = arith.cmpi sge, %8, %26 : vector<1x128xi32>
    %cst_10 = arith.constant 0.000000e+00 : f32
    %28 = vector.shape_cast %27 : vector<1x128xi1> to vector<1x128xi1>
    %29 = vector.broadcast %28 : vector<1x128xi1> to vector<4x128xi1>
    %30 = vector.broadcast %cst_10 : f32 to vector<4x128xf32>
    %31 = arith.select %29, %25, %30 : vector<4x128xi1>, vector<4x128xf32>
    %c8 = arith.constant 8 : index
    %c0_11 = arith.constant 0 : index
    %32 = vector.load %arg5[%c8, %c0_11] : memref<37x128xf32, #tpu.memory_space<vmem>>, vector<4x128xf32>
    tpu.vector_store %arg5[%c8, %c0_11], %31 {strides = array<i32>} : memref<37x128xf32, #tpu.memory_space<vmem>>, vector<4x128xf32>,
    %c12 = arith.constant 12 : index
    %c0_12 = arith.constant 0 : index
    %33 = vector.load %arg5[%c12, %c0_12] : memref<37x128xf32, #tpu.memory_space<vmem>>, vector<4x128xf32>
    tpu.vector_store %arg5[%c12, %c0_12], %1 {strides = array<i32>} : memref<37x128xf32, #tpu.memory_space<vmem>>, vector<4x128xf32>,
    %c127_i32 = arith.constant 127 : i32
    %34 = tpu.dynamic_rotate %1 by %c127_i32 dim 1 : vector<4x128xf32>, i32 -> vector<4x128xf32>
    %c63_i32 = arith.constant 63 : i32
    %35 = vector.broadcast %c63_i32 : i32 to vector<1x128xi32>
    %36 = arith.cmpi slt, %8, %35 : vector<1x128xi32>
    %cst_13 = arith.constant 0.000000e+00 : f32
    %37 = vector.shape_cast %36 : vector<1x128xi1> to vector<1x128xi1>
    %38 = vector.broadcast %37 : vector<1x128xi1> to vector<4x128xi1>
    %39 = vector.broadcast %cst_13 : f32 to vector<4x128xf32>
    %40 = arith.select %38, %34, %39 : vector<4x128xi1>, vector<4x128xf32>
    %c16 = arith.constant 16 : index
    %c0_14 = arith.constant 0 : index
    %41 = vector.load %arg5[%c16, %c0_14] : memref<37x128xf32, #tpu.memory_space<vmem>>, vector<4x128xf32>
    tpu.vector_store %arg5[%c16, %c0_14], %40 {strides = array<i32>} : memref<37x128xf32, #tpu.memory_space<vmem>>, vector<4x128xf32>,
    %c126_i32 = arith.constant 126 : i32
    %42 = tpu.dynamic_rotate %1 by %c126_i32 dim 1 : vector<4x128xf32>, i32 -> vector<4x128xf32>
    %c62_i32 = arith.constant 62 : i32
    %43 = vector.broadcast %c62_i32 : i32 to vector<1x128xi32>
    %44 = arith.cmpi slt, %8, %43 : vector<1x128xi32>
    %cst_15 = arith.constant 0.000000e+00 : f32
    %45 = vector.shape_cast %44 : vector<1x128xi1> to vector<1x128xi1>
    %46 = vector.broadcast %45 : vector<1x128xi1> to vector<4x128xi1>
    %47 = vector.broadcast %cst_15 : f32 to vector<4x128xf32>
    %48 = arith.select %46, %42, %47 : vector<4x128xi1>, vector<4x128xf32>
    %c20 = arith.constant 20 : index
    %c0_16 = arith.constant 0 : index
    %49 = vector.load %arg5[%c20, %c0_16] : memref<37x128xf32, #tpu.memory_space<vmem>>, vector<4x128xf32>
    tpu.vector_store %arg5[%c20, %c0_16], %48 {strides = array<i32>} : memref<37x128xf32, #tpu.memory_space<vmem>>, vector<4x128xf32>,
    %c125_i32 = arith.constant 125 : i32
    %50 = tpu.dynamic_rotate %1 by %c125_i32 dim 1 : vector<4x128xf32>, i32 -> vector<4x128xf32>
    %c61_i32 = arith.constant 61 : i32
    %51 = vector.broadcast %c61_i32 : i32 to vector<1x128xi32>
    %52 = arith.cmpi slt, %8, %51 : vector<1x128xi32>
    %cst_17 = arith.constant 0.000000e+00 : f32
    %53 = vector.shape_cast %52 : vector<1x128xi1> to vector<1x128xi1>
    %54 = vector.broadcast %53 : vector<1x128xi1> to vector<4x128xi1>
    %55 = vector.broadcast %cst_17 : f32 to vector<4x128xf32>
    %56 = arith.select %54, %50, %55 : vector<4x128xi1>, vector<4x128xf32>
    %c24 = arith.constant 24 : index
    %c0_18 = arith.constant 0 : index
    %57 = vector.load %arg5[%c24, %c0_18] : memref<37x128xf32, #tpu.memory_space<vmem>>, vector<4x128xf32>
    tpu.vector_store %arg5[%c24, %c0_18], %56 {strides = array<i32>} : memref<37x128xf32, #tpu.memory_space<vmem>>, vector<4x128xf32>,
    %c124_i32 = arith.constant 124 : i32
    %58 = tpu.dynamic_rotate %1 by %c124_i32 dim 1 : vector<4x128xf32>, i32 -> vector<4x128xf32>
    %c60_i32 = arith.constant 60 : i32
    %59 = vector.broadcast %c60_i32 : i32 to vector<1x128xi32>
    %60 = arith.cmpi slt, %8, %59 : vector<1x128xi32>
    %cst_19 = arith.constant 0.000000e+00 : f32
    %61 = vector.shape_cast %60 : vector<1x128xi1> to vector<1x128xi1>
    %62 = vector.broadcast %61 : vector<1x128xi1> to vector<4x128xi1>
    %63 = vector.broadcast %cst_19 : f32 to vector<4x128xf32>
    %64 = arith.select %62, %58, %63 : vector<4x128xi1>, vector<4x128xf32>
    %c28 = arith.constant 28 : index
    %c0_20 = arith.constant 0 : index
    %65 = vector.load %arg5[%c28, %c0_20] : memref<37x128xf32, #tpu.memory_space<vmem>>, vector<4x128xf32>
    tpu.vector_store %arg5[%c28, %c0_20], %64 {strides = array<i32>} : memref<37x128xf32, #tpu.memory_space<vmem>>, vector<4x128xf32>,
    %c1_i32_21 = arith.constant 1 : i32
    %66 = vector.broadcast %c1_i32_21 : i32 to vector<1x128xi32>
    %67 = arith.cmpi sge, %8, %66 : vector<1x128xi32>
    %68 = vector.shape_cast %67 : vector<1x128xi1> to vector<1x128xi1>
    %69 = vector.broadcast %68 : vector<1x128xi1> to vector<4x128xi1>
    %70 = arith.select %69, %25, %1 : vector<4x128xi1>, vector<4x128xf32>
    %c63_i32_22 = arith.constant 63 : i32
    %71 = vector.broadcast %c63_i32_22 : i32 to vector<1x128xi32>
    %72 = arith.cmpi slt, %8, %71 : vector<1x128xi32>
    %73 = vector.shape_cast %72 : vector<1x128xi1> to vector<1x128xi1>
    %74 = vector.broadcast %73 : vector<1x128xi1> to vector<4x128xi1>
    %75 = arith.select %74, %34, %1 : vector<4x128xi1>, vector<4x128xf32>
    %76 = arith.maximumf %70, %1 : vector<4x128xf32>
    %77 = arith.maximumf %76, %75 : vector<4x128xf32>
    %c32 = arith.constant 32 : index
    %c0_23 = arith.constant 0 : index
    %78 = vector.load %arg5[%c32, %c0_23] : memref<37x128xf32, #tpu.memory_space<vmem>>, vector<4x128xf32>
    tpu.vector_store %arg5[%c32, %c0_23], %77 {strides = array<i32>} : memref<37x128xf32, #tpu.memory_space<vmem>>, vector<4x128xf32>,
    %cst_24 = arith.constant 1.000000e+00 : f32
    %79 = vector.broadcast %cst_24 : f32 to vector<1x128xf32>
    %c36 = arith.constant 36 : index
    %c0_25 = arith.constant 0 : index
    %80 = vector.load %arg5[%c36, %c0_25] : memref<37x128xf32, #tpu.memory_space<vmem>>, vector<1x128xf32>
    tpu.vector_store %arg5[%c36, %c0_25], %79 {strides = array<i32>} : memref<37x128xf32, #tpu.memory_space<vmem>>, vector<1x128xf32>,
    %c0_26 = arith.constant 0 : index
    %c0_27 = arith.constant 0 : index
    %81 = vector.load %arg3[%c0_26, %c0_27] : memref<32x37xf32, #tpu.memory_space<vmem>>, vector<32x37xf32>
    %c0_28 = arith.constant 0 : index
    %c0_29 = arith.constant 0 : index
    %82 = vector.load %arg5[%c0_28, %c0_29] : memref<37x128xf32, #tpu.memory_space<vmem>>, vector<37x128xf32>
    %cst_30 = arith.constant dense<0.000000e+00> : vector<32x128xf32>
    %83 = tpu.matmul %81, %82, %cst_30 {dimension_numbers = #tpu.dot_dimension_numbers<[1], [0], [0], [1], [0, 0, 1, 1], [], []>} : vector<32x37xf32>, vector<37x128xf32>, vector<32x128xf32> -> vector<32x128xf32>
    %cst_31 = arith.constant 0.000000e+00 : f32
    %84 = vector.broadcast %cst_31 : f32 to vector<32x128xf32>
    %85 = arith.maximumf %83, %84 : vector<32x128xf32>
    %c0_32 = arith.constant 0 : index
    %c0_33 = arith.constant 0 : index
    %c0_34 = arith.constant 0 : index
    %86 = vector.load %arg4[%c0_32, %c0_33, %c0_34] : memref<1x32x128xf32, #tpu.memory_space<vmem>>, vector<1x32x128xf32>
    %87 = vector.shape_cast %86 : vector<1x32x128xf32> to vector<32x128xf32>
    %88 = vector.shape_cast %85 : vector<32x128xf32> to vector<1x32x128xf32>
    tpu.vector_store %arg4[%c0_32, %c0_33, %c0_34], %88 {strides = array<i32>} : memref<1x32x128xf32, #tpu.memory_space<vmem>>, vector<1x32x128xf32>,
    return
  }
  func.func @transform_0(%arg0: i32, %arg1: i32) -> (i32, i32, i32) {
    %c0_i32 = arith.constant 0 : i32
    %c0_i32_0 = arith.constant 0 : i32
    return %arg0, %c0_i32, %arg1 : i32, i32, i32
  }
  func.func @transform_1(%arg0: i32, %arg1: i32) -> (i32, i32) {
    %c0_i32 = arith.constant 0 : i32
    %c0_i32_0 = arith.constant 0 : i32
    %c0_i32_1 = arith.constant 0 : i32
    return %c0_i32, %c0_i32_0 : i32, i32
  }
  func.func @transform_2(%arg0: i32, %arg1: i32) -> (i32, i32, i32) {
    %c0_i32 = arith.constant 0 : i32
    %c0_i32_0 = arith.constant 0 : i32
    return %arg0, %c0_i32, %arg1 : i32, i32, i32
  }
}

</mosaic_0001>

<bundles_post_ra>
// kernel: tpu_custom_call.1
= control target key start
LH: loop header
LB: loop body
LE: loop exit
PB: predicated region body
PF: predicated region fallthrough
CT: control target
= control target key end

     0   :  { %s1036_s0 = inlined_call_operand.hbm [shape: f32[2,4,512], index: 0, kind: input, shape index: {}]   ;;  %s1037_s1 = inlined_call_operand.hbm [shape: f32[32,37], index: 1, kind: input, shape index: {}]   ;;  %s1038_s2 = inlined_call_operand.hbm [shape: f32[2,32,512], index: 2, kind: output, shape index: {}]  }
   0x1   :  { %1043 = sst [smem:[#allocation15_spill]] %s1037_s1 }
   0x2   :  { %7 = vsyncpa [#allocation4], 0 }
   0x3   :  { %9 = vsyncpa [#allocation4 + $0x1], 0 }
   0x4   :  { %10 = vsyncpa [#allocation7], 0 }
   0x5   :  { %11 = vsyncpa [#allocation5], 0 }
   0x6   :  { %13 = vsyncpa [#allocation5 + $0x1], 0  ;;  %s834_s9 = smov 0   ;;  %s836_s10 = smov 0  }
   0x7   :  { %s838_s11 = smov 0   ;;  %s840_s12 = smov 0  }
   0x8   :  { %s842_s13 = smov 0   ;;  %s844_s14 = smov 0  }
   0x9   :  { %s846_s15 = smov 0   ;;  %s848_s16 = smov 0  }
   0xa LB: > { %1044 = sst [smem:[#allocation12_spill]] %s772_s9  ;;  %s486_s17 = sadd.s32 4294967295, %s800_s16   ;;  %s800_s16 = sphi %s848_s16, %s19_s16   ;;  %s796_s15 = sphi %s846_s15, %s1067_s15   ;;  %s792_s14 = sphi %s844_s14, %s1066_s14   ;;  %s788_s13 = sphi %s842_s13, %s1065_s13   ;;  %s784_s12 = sphi %s840_s12, %s1064_s12   ;;  %s780_s11 = sphi %s838_s11, %s1063_s11   ;;  %s776_s10 = sphi %s836_s10, %s1062_s10   ;;  %s772_s9 = sphi %s834_s9, %s1061_s9  }
   0xb   : > { %s487_s18 = sadd.s32 4294967294, %s800_s16   ;;  %p53_p0 = scmp.ne.s32.totalorder %s776_s10, %s772_s9 }
   0xc   : > { %p878_p1 = scmp.eq.s32.totalorder %s486_s17, 0  ;;  %p882_p2 = scmp.eq.s32.totalorder %s486_s17, 7 }
   0xd   : > { %p106_p3 = scmp.eq.s32.totalorder %s487_s18, 7  ;;  %p488_p5 = scmp.ge.s32.totalorder %s800_s16, 1 }
   0xe   : > { %p888_p4 = por %p878_p1, %p53_p0  ;;  %p113_p7 = scmp.lt.s32.totalorder %s800_s16, 9 }
   0xf   : > { %p893_p6 = por %p106_p3, %p53_p0  ;;  %s802_s24 = smov [#allocation6]  }
  0x10   : > { %s1047_s21 = scalar_select %p888_p4, 1, 0 }
  0x11   : > { %s1048_s22 = scalar_select %p893_p6, 1, 0 }
  0x12   : > { %p898_p8 = pnand %p488_p5, %p113_p7  ;;  %s125_s25 = sshll.u32 %s802_s24, 4  ;;  %s126_s25 = int_to_ptr.vmem [resolvable:$true] %s125_s25 }
  0x13   : > { %1049 = sst [smem:[#allocation13_spill]] %s1048_s22  ;;  %s657_s26 = scalar_lea.vmem %s126_s25, 512 }
  0x14   : > { %p551_p9 = pneg %p898_p8  ;;  %p658_p12 = scmp.ne.s32.totalorder %s126_s25, %s657_s26 }
  0x15   : > { %p665_p3 = scmp.lt.s32.totalorder %s126_s25, %s126_s25  ;;  %p666_p6 = scmp.lt.s32.totalorder %s657_s26, %s657_s26 }
  0x16   : > { %p552_p10 = pnand %p551_p9, %p878_p1 }
  0x17   : > { %p667_p4 = por %p666_p6, %p665_p3 }
  0x18   : > { %p648_p11 = pneg %p552_p10 }
  0x1a   : > { %p660_p13 = pnand %p658_p12, %p648_p11 }
  0x1c   : > { %p661_p0 = pneg %p660_p13 }
  0x1e   : > { %p668_p5 = pnand %p667_p4, %p661_p0 }
  0x20   : > { %671 = shalt.err (!%p668_p5)
}
  0x21   : > { %s803_s27 = smov 128   ;;  %s804_s28 = smov 8  }
  0x22   : > { %s1051_s1 = sld [smem:[#allocation15_spill]]  ;;  %s28_s3 = sadd.s32 1, %s792_s14 }
  0x23   : > { %p29_p4 = scmp.ge.s32.totalorder %s28_s3, 4  ;;  %s31_s4 = sadd.s32 1, %s796_s15 }
  0x24   : > { %s40_s5 = sadd.s32 1, %s780_s11  ;;  %p47_p6 = scmp.ne.s32.totalorder %s780_s11, %s776_s10 }
  0x25   : > { %s1069_s3 = smov (%p29_p4, %s28_s3), 0  ;;  %s1071_s4 = smov (!%p29_p4, %s31_s4), %s796_s15 }
  0x26   : > { %1052 = sst [smem:[#allocation14_spill]] %s1069_s3  ;;  %s36_s6 = ssub.s32 %s792_s14, %s1069_s3 }
  0x27   : > { %p48_p7 = scmp.eq.s32.totalorder %s800_s16, 0  ;;  %p33_p9 = scmp.ge.s32.totalorder %s1071_s4, 2 }
  0x28   : > { %554 = dma.hbm_to_vmem [thread:$0]  (!%p552_p10), %s1051_s1, 512, %s126_s25, [#allocation7], %s803_s27, %s803_s27, %s804_s28  }
  0x29   : > { %p922_p11 = por %p882_p2, %p47_p6  ;;  %p926_p10 = por %p48_p7, %p47_p6 }
  0x2a   : > { %p564_p12 = scmp.lt.s32.totalorder %s800_s16, 8  ;;  %s1073_s4 = smov (%p33_p9, %s1071_s4), 0 }
  0x2b   : > { %s139_s17 = sand.u32 1, %s780_s11   ;;  %s492_s18 = sshll.u32 %s796_s15, 2 }
  0x2c   : > { %s35_s24 = ssub.s32 %s796_s15, %s1073_s4  ;;  %s491_s26 = sshll.u32 %s139_s17, 2 }
  0x2d   : > { %s37_s25 = sor.u32 %s36_s6, %s35_s24  ;;  %s148_s20 = sadd.s32 %s792_s14, %s492_s18 }
  0x2e   : > { %p38_p13 = scmp.eq.s32.totalorder %s37_s25, 0  ;;  %s143_s27 = scalar_lea.vmem [#allocation3], %s491_s26 }
  0x2f   : > { %s152_s28 = sshll.u32 %s143_s27, 4  ;;  %s493_s30 = sshll.u32 %s148_s20, 6  ;;  %s153_s28 = int_to_ptr.vmem [resolvable:$true] %s152_s28 }
  0x30   : > { %s939_s29 = scalar_select %p38_p13, %s780_s11, %s40_s5  }
  0x31   : > { %s150_s22 = scalar_lea.hbm %s1036_s0, %s493_s30  ;;  %p948_p2 = pnand %p564_p12, %p926_p10 }
  0x32   : > { %s140_s6 = scalar_lea.sflag [#allocation4], %s139_s17  ;;  %s685_s18 = scalar_lea.vmem %s153_s28, 64 }
  0x33   : > { %p674_p0 = pneg %p948_p2  ;;  %p686_p3 = scmp.ne.s32.totalorder %s153_s28, %s685_s18 }
  0x34   : > { %s805_s5 = smov [#allocation3]  }
  0x35   : > { %p688_p5 = pnand %p686_p3, %p674_p0  ;;  %s690_s24 = sshll.u32 %s805_s5, 4  ;;  %s691_s24 = int_to_ptr.vmem [resolvable:$false] %s690_s24 }
  0x36   : > { %s692_s25 = scalar_lea.vmem %s691_s24, 128  ;;  %p693_p6 = scmp.lt.s32.totalorder %s153_s28, %s691_s24 }
  0x37   : > { %p689_p4 = pneg %p688_p5  ;;  %p694_p7 = scmp.lt.s32.totalorder %s692_s25, %s685_s18 }
  0x39   : > { %p695_p9 = por %p694_p7, %p693_p6 }
  0x3b   : > { %p696_p13 = pnand %p695_p9, %p689_p4 }
  0x3d   : > { %699 = shalt.err (!%p696_p13)
}
  0x3e   : > { %558 = dma.hbm_to_vmem [thread:$0]  (!%p948_p2), %s150_s22, 64, %s153_s28, %s140_s6  }
  0x3f   : > { %161 = sbr.rel (%p898_p8) target bundleno = 425 (0x1a9), region = 28  ;;  %s959_s1 = sand.u32 (!%p898_p8), 1, %s776_s10  }
  0x40   : > { %s495_s3 = sshll.u32 (!%p898_p8), %s959_s1, 2  ;;  %s164_s8 = scalar_lea.sflag (!%p898_p8), [#allocation4], %s959_s1 }
  0x41   : > { %s167_s17 = scalar_lea.vmem (!%p898_p8), [#allocation3], %s495_s3  ;;  %p1056_p10 = scmp.ne.s32.totalorder (!%p898_p8), %s1047_s21, 0 }
  0x44   : > { %759 = dma.done.wait (%p1056_p10), %s164_s8, 64  }
  0x45   : > { %761 = vsyncadd (%p1056_p10), %s164_s8, 4294967232 }
  0x46   : > { %763 = dma.done.wait (%p878_p1), [#allocation7], 512  }
  0x47   : > { %765 = vsyncadd (%p878_p1), [#allocation7], 4294966784  ;;  %v806_v0 = vmov 1.0   ;;  %v192_v1 = vld [vmem:[%s167_s17] sm:$0xf]  ;;  %s807_s9 = smov 125   ;;  %v193_v4 = vlaneseq }
  0x48   : > { %253 = vst [vmem:[#allocation2 + $0x24] sm:$0x1] %v806_v0  ;;  %234 = vrot.lane.b32.xlu1 %v192_v1, %s807_s9  ;;  %219 = vst [vmem:[#allocation2 + $0xc] sm:$0xf] %v192_v1  ;;  %s808_s22 = smov 1   ;;  %s809_s23 = smov 124  }
  0x49   : > { %212 = vrot.lane.b32.xlu0 %v192_v1, %s808_s22  ;;  %s810_s26 = smov 127   ;;  %s811_s21 = smov 126   ;;  %v254_v2 = vld [vmem:[#allocation6] sm:$0xff]  ;;  %vm263_vm0 = vcmask 302080   ;;  %v256_v3 = vld [vmem:[#allocation6 + $0x10] sm:$0xff]  ;;  %v194_v5 = vand.u32 127, %v193_v4 }
  0x4a   : > { %s812_s20 = smov 3   ;;  %527 = vmatprep.mubr.msk.f32.mxu0 %vm263_vm0, %v254_v2  ;;  %530 = vmatprep.mubr.msk.f32.mxu1 %vm263_vm0, %v256_v3  ;;  %s813_s19 = smov 2   ;;  %v814_v6 = vmov 0   ;;  %vm276_vm9 = vcmask 1044480   ;;  %v255_v32 = vld [vmem:[#allocation6 + $0x8] sm:$0xff]  ;;  %v257_v33 = vld [vmem:[#allocation6 + $0x18] sm:$0xff] }
  0x4b   : > { %vm195_vm1 = vcmp.ge.s32.totalorder %v194_v5, 64  ;;  %s497_s27 = sshll.u32 %s959_s1, 5  ;;  %s504_s28 = sshll.u32 %s788_s13, 4 }
  0x4c   : > { %241 = vrot.lane.b32.xlu1 %v192_v1, %s809_s23  ;;  %v196_v7 = vsel %vm195_vm1, 64, %v814_v6  ;;  %s385_s30 = sadd.s32 %s784_s12, %s504_s28  ;;  %s191_s6 = scalar_lea.vmem [#allocation8], %s497_s27 }
  0x4d   : > { %220 = vrot.lane.b32.xlu0 %v192_v1, %s810_s26  ;;  %v197_v8 = vsub.s32 %v194_v5, %v196_v7  ;;  %s388_s18 = sshll.u32 %s191_s6, 4  ;;  %s505_s5 = sshll.u32 %s385_s30, 7  ;;  %s978_s18 = int_to_ptr.vmem [resolvable:$true] %s388_s18 }
  0x4e   : > { %s983_s13 = scalar_lea.hbm %s1038_s2, %s505_s5  ;;  %s374_s12 = scalar_lea.sflag [#allocation5], %s959_s1 }
  0x4f   : > { %vm236_vm2 = vcmp.lt.s32.totalorder %v197_v8, 61  ;;  %vm214_vm3 = vcmp.ge.s32.totalorder %v197_v8, 1  ;;  %vm243_vm4 = vcmp.lt.s32.totalorder %v197_v8, 60  ;;  %vm222_vm5 = vcmp.lt.s32.totalorder %v197_v8, 63  ;;  %s700_s3 = scalar_lea.vmem %s978_s18, 512  ;;  %s815_s8 = smov [#allocation8]  }
  0x50   : > { %198 = vrot.lane.b32.xlu1 %v192_v1, %s812_s20  ;;  %vm229_vm6 = vcmp.lt.s32.totalorder %v197_v8, 62  ;;  %vm200_vm7 = vcmp.ge.s32.totalorder %v197_v8, 3  ;;  %vm207_vm8 = vcmp.ge.s32.totalorder %v197_v8, 2  ;;  %p701_p1 = scmp.ne.s32.totalorder %s978_s18, %s700_s3  ;;  %s704_s17 = sshll.u32 %s815_s8, 4  ;;  %s705_s17 = int_to_ptr.vmem [resolvable:$false] %s704_s17 }
  0x51   : > { %227 = vrot.lane.b32.xlu0 %v192_v1, %s811_s21  ;;  %s706_s9 = scalar_lea.vmem %s705_s17, 1024  ;;  %p707_p2 = scmp.lt.s32.totalorder %s978_s18, %s705_s17 }
  0x52   : > { %p702_p8 = pnand %p701_p1, %p922_p11  ;;  %p708_p0 = scmp.lt.s32.totalorder %s706_s9, %s700_s3 }
  0x54   : > { %p703_p12 = pneg %p702_p8  ;;  %p709_p3 = por %p708_p0, %p707_p2 }
  0x55   : > { %205 = vrot.lane.b32.xlu0 %v192_v1, %s813_s19 }
  0x56   : > { %p710_p5 = pnand %p709_p3, %p703_p12 }
  0xba   : > { %v235_v9 = vpop.permute.xlu1 %234 }
  0xbb   : > { %v213_v10 = vpop.permute.xlu0 %212  ;;  %v239_v11 = vsel %vm236_vm2, %v235_v9, 0.0 }
  0xbc   : > { %v217_v12 = vsel %vm214_vm3, %v213_v10, 0.0  ;;  %v248_v13 = vsel %vm214_vm3, %v213_v10, %v192_v1  ;;  %240 = vst [vmem:[#allocation2 + $0x18] sm:$0xf] %v239_v11 }
  0xbd   : > { %218 = vst [vmem:[#allocation2 + $0x8] sm:$0xf] %v217_v12  ;;  %v250_v14 = vmax.f32 %v248_v13, %v192_v1 }
  0xbe   : > { %v242_v15 = vpop.permute.xlu1 %241 }
  0xbf   : > { %v221_v16 = vpop.permute.xlu0 %220  ;;  %v246_v17 = vsel %vm243_vm4, %v242_v15, 0.0 }
  0xc0   : > { %v225_v18 = vsel %vm222_vm5, %v221_v16, 0.0  ;;  %v249_v19 = vsel %vm222_vm5, %v221_v16, %v192_v1  ;;  %247 = vst [vmem:[#allocation2 + $0x1c] sm:$0xf] %v246_v17 }
  0xc1   : > { %226 = vst [vmem:[#allocation2 + $0x10] sm:$0xf] %v225_v18  ;;  %v251_v20 = vmax.f32 %v250_v14, %v249_v19 }
  0xc2   : > { %v199_v22 = vpop.permute.xlu1 %198 }
  0xc3   : > { %252 = vst [vmem:[#allocation2 + $0x20] sm:$0xf] %v251_v20  ;;  %v228_v21 = vpop.permute.xlu0 %227  ;;  %v203_v24 = vsel %vm200_vm7, %v199_v22, 0.0 }
  0xc4   : > { %v232_v23 = vsel %vm229_vm6, %v228_v21, 0.0  ;;  %204 = vst [vmem:[#allocation2] sm:$0xf] %v203_v24  ;;  %v259_v30 = vld [vmem:[#allocation2 + $0x8] sm:$0xff] }
  0xc5   : > { %233 = vst [vmem:[#allocation2 + $0x14] sm:$0xf] %v232_v23 }
  0xc7   : > { %v206_v25 = vpop.permute.xlu0 %205  ;;  %v261_v28 = vld [vmem:[#allocation2 + $0x18] sm:$0xff] }
  0xc8   : > { %v210_v26 = vsel %vm207_vm8, %v206_v25, 0.0 }
  0xc9   : > { %211 = vst [vmem:[#allocation2 + $0x4] sm:$0xf] %v210_v26 }
  0xca   : > { %v262_v27 = vld [vmem:[#allocation2 + $0x20] sm:$0x1f] }
  0xcb   : > { %517 = vmatprep.subr.msk.mxu0 %vm276_vm9, %v262_v27  ;;  %533 = vmatprep.subr.msk.mxu1 %vm276_vm9, %v262_v27 }
  0xcc   : > { %518 = vmatpush3.msk.msra.mxu0 %vm276_vm9, %v262_v27  ;;  %538 = vmatpush3.msk.msra.mxu1 %vm276_vm9, %v262_v27  ;;  %v260_v29 = vld [vmem:[#allocation2 + $0x10] sm:$0xff] }
  0xcd   : > { %519 = vmatprep.subr.mxu0 %v261_v28  ;;  %534 = vmatprep.subr.mxu1 %v261_v28 }
  0xce   : > { %520 = vmatpush3.msra.mxu0 %v261_v28  ;;  %539 = vmatpush3.msra.mxu1 %v261_v28 }
  0xcf   : > { %521 = vmatprep.subr.mxu0 %v260_v29  ;;  %535 = vmatprep.subr.mxu1 %v260_v29 }
  0xd0   : > { %522 = vmatpush3.msra.mxu0 %v260_v29  ;;  %540 = vmatpush3.msra.mxu1 %v260_v29  ;;  %v258_v31 = vld [vmem:[#allocation2] sm:$0xff] }
  0xd1   : > { %523 = vmatprep.subr.mxu0 %v259_v30  ;;  %536 = vmatprep.subr.mxu1 %v259_v30 }
  0xd2   : > { %524 = vmatpush3.msra.mxu0 %v259_v30  ;;  %541 = vmatpush3.msra.mxu1 %v259_v30 }
  0xd3   : > { %525 = vmatprep.subr.mxu0 %v258_v31  ;;  %537 = vmatprep.subr.mxu1 %v258_v31 }
  0xd4   : > { %526 = vmatpush3.msra.mxu0 %v258_v31  ;;  %542 = vmatpush3.msra.mxu1 %v258_v31 }
  0xd5   : > { %528 = vmatmul.mubr.msk.f32.vlgmr.msra.gmra.mxu0 %vm263_vm0, %v255_v32  ;;  %531 = vmatmul.mubr.msk.f32.vlgmr.msra.gmra.mxu1 %vm263_vm0, %v257_v33 }
 0x195   : > { %v529_v34 = vpop.f32.mrf.mxu0  ;;  %v532_v35 = vpop.f32.mrf.mxu1 }
 0x196   : > { %v366_v36 = vmax.f32 %v529_v34, 0.0  ;;  %v368_v37 = vmax.f32 %v532_v35, 0.0 }
 0x197   : > { %v346_v38 = vpop.f32.mrf.mxu0  ;;  %v356_v39 = vpop.f32.mrf.mxu1 }
 0x198   : > { %370 = vst [vmem:[%s191_s6 + $0x8] sm:$0xff] %v366_v36  ;;  %372 = vst [vmem:[%s191_s6 + $0x18] sm:$0xff] %v368_v37  ;;  %v365_v40 = vmax.f32 %v346_v38, 0.0  ;;  %v367_v41 = vmax.f32 %v356_v39, 0.0 }
 0x19a   : > { %369 = vst [vmem:[%s191_s6] sm:$0xff] %v365_v40  ;;  %371 = vst [vmem:[%s191_s6 + $0x10] sm:$0xff] %v367_v41 }
 0x19b   : > { %713 = shalt.err (!%p710_p5)
}
 0x19c   : > { %s714_s22 = scalar_lea.hbm %s983_s13, 512  ;;  %s718_s21 = scalar_lea.hbm %s1038_s2, 4096 }
 0x19d   : > { %p715_p4 = scmp.ne.s32.totalorder %s983_s13, %s714_s22  ;;  %p719_p9 = scmp.lt.s32.totalorder %s983_s13, %s1038_s2 }
 0x19e   : > { %p720_p13 = scmp.lt.s32.totalorder %s718_s21, %s714_s22 }
 0x19f   : > { %p716_p6 = pnand %p715_p4, %p922_p11 }
 0x1a0   : > { %p721_p10 = por %p720_p13, %p719_p9 }
 0x1a1   : > { %p717_p7 = pneg %p716_p6 }
 0x1a3   : > { %p722_p1 = pnand %p721_p10, %p717_p7 }
 0x1a5   : > { %725 = shalt.err (!%p722_p1)
}
 0x1a6   : > { %s816_s27 = smov 128   ;;  %s817_s28 = smov 512  }
 0x1a7   : > { %s818_s30 = smov 8  }
 0x1a8   : > { %549 = dma.vmem_to_hbm [thread:$0]  (%p922_p11), %s978_s18, 512, %s983_s13, %s374_s12, %s816_s27, %s817_s28, %s818_s30  }
 0x1a9 PF: > { %s1057_s6 = sld [smem:[#allocation12_spill]]  ;;  %p566_p8 = scmp.ge.s32.totalorder %s800_s16, 2 }
 0x1aa   : > { %s1058_s5 = sld [smem:[#allocation13_spill]] }
 0x1af   : > { %s403_s24 = sand.u32 1, %s1057_s6  }
 0x1b0   : > { %p1059_p12 = scmp.ne.s32.totalorder %s1058_s5, 0  ;;  %s404_s25 = scalar_lea.sflag [#allocation5], %s403_s24 }
 0x1b2   : > { %p560_p2 = pnand %p566_p8, %p1059_p12 }
 0x1b4   : > { %p561_p0 = pneg %p560_p2 }
 0x1b6   : > { %767 = dma.done.wait (%p561_p0), %s404_s25, 512  }
 0x1b7   : > { %769 = vsyncadd (%p561_p0), %s404_s25, 4294966784  ;;  %s19_s16 = sadd.s32 1, %s800_s16   ;;  %s1060_s7 = sld [smem:[#allocation14_spill]] }
 0x1b8   : > { %p16_p3 = scmp.ge.s32.totalorder %s19_s16, 10   ;;  %s1061_s9 = smov %s776_s10 }
 0x1b9   : > { %s1062_s10 = smov %s780_s11  ;;  %s1063_s11 = smov %s939_s29 }
 0x1ba   : > { %s1064_s12 = smov %s792_s14  ;;  %s1065_s13 = smov %s796_s15 }
 0x1bb   : > { %s1067_s15 = smov %s1073_s4  ;;  %18 = sbr.rel (!%p16_p3) target bundleno = 10 (0xa), region = 77 }
 0x1bd   : > { %s1066_s14 = smov %s1060_s7 }
 0x1c0   :  { %409 = vsyncpa [#allocation4], 1 }
 0x1c1   :  { %411 = vsyncpa [#allocation4 + $0x1], 1 }
 0x1c2   :  { %412 = vsyncpa [#allocation7], 1 }
 0x1c3   :  { %413 = vsyncpa [#allocation5], 1 }
 0x1c4   :  { %415 = vsyncpa [#allocation5 + $0x1], 1 }

</bundles_post_ra>
